<compile_context>
chip_gen: v6e
topology: v6e:2x2x1
jax: 0.10.0
libtpu: 0.0.40
codegen_flags: <defaults>
</compile_context>

<pallas_src>
import functools

import jax
import jax.numpy as jnp
from jax import lax
from jax.experimental import pallas as pl
from jax.experimental.pallas import tpu as pltpu


# ---------------------------------------------------------------------------
# Pallas kernel
# ---------------------------------------------------------------------------
def _cluster_assign_kernel(x_ref, c_ref, c2_ref, out_ref, *,
                           inv_alpha: float, power: float):
    x = x_ref[...].astype(jnp.float32)            # [TB, D]  f32 row-tile
    c = c_ref[...]                                # [Kp, D]  bf16 centers (resident)
    c2 = c2_ref[...]                              # [1, Kp]  f32 ||c||^2 (pad cols = 1e30)

    # ||x_b - c_k||^2 = ||x_b||^2 + ||c_k||^2 - 2 <x_b, c_k>
    # MXU contraction over the last dim of both operands (no explicit c.T);
    # bf16 operands, f32 accumulation.
    xc = lax.dot_general(x.astype(jnp.bfloat16), c, (((1,), (1,)), ((), ())),
                         preferred_element_type=jnp.float32)   # [TB, Kp]
    x2 = jnp.sum(x * x, axis=-1, keepdims=True)                # [TB, 1]
    norm_sq = jnp.maximum(x2 + c2 - 2.0 * xc, 0.0)             # clamp cancellation
    # Padded cluster columns carry c2 = 1e30 -> their numerators underflow to
    # ~0, so no explicit iota/where mask is needed in the epilogue.

    # Student's-t kernel; approximate reciprocal goes to the EUP slot.
    numerator = pl.reciprocal(1.0 + norm_sq * inv_alpha, approx=True)
    if power != 1.0:   # alpha is a static Python float -> skips exp/log for alpha==1
        numerator = numerator ** power

    denom = jnp.sum(numerator, axis=1, keepdims=True)          # [TB, 1]
    # Exact divide for the row normalisation (rows sum to 1 within f32).
    out_ref[...] = (numerator / denom).astype(out_ref.dtype)


# ---------------------------------------------------------------------------
# Wrapper helpers
# ---------------------------------------------------------------------------
def _round_up(x: int, m: int) -> int:
    return ((x + m - 1) // m) * m


def _cdiv(a: int, b: int) -> int:
    return (a + b - 1) // b


def _vmem_budget_bytes() -> int:
    try:
        cap = int(pltpu.get_tpu_info().vmem_capacity_bytes)
    except Exception:
        cap = 64 << 20          # assume the smallest (v7x) part if query fails
    # ~half of physical VMEM: 64 MiB on 128 MiB parts (v5e/v6e), 32 MiB on v7x.
    return max(16 << 20, cap // 2)


def _choose_tile_b(b: int, d: int, k_pad: int, budget: int) -> int:
    """Pick a row tile that fits the VMEM budget, keeps the grid multi-step,
    and is MXU-friendly along M."""
    # Constant inputs are still double-buffered by Pallas by default.
    resident = 2 * (k_pad * d * 2) + 2 * (k_pad * 4)         # bf16 centers + f32 c2
    # Double-buffered f32 x tile + in-kernel bf16 cast copy +
    # double-buffered f32 out tile + ~4 f32 epilogue temporaries
    # (xc / norm_sq / numerator / store cast).
    per_row = (2 * d * 4) + (d * 2) + (2 * k_pad * 4) + (4 * k_pad * 4)
    tile = (budget - resident) // max(per_row, 1)
    tile = max(8, min(int(tile), 512))
    # Keep the row grid multi-step (pipelining + megacore sharding) when B is
    # large enough for the per-step overhead to be amortised.
    if b >= 8 * 256:
        tile = min(tile, _round_up(_cdiv(b, 8), 256))
    elif b >= 2 * 256:
        tile = min(tile, _round_up(_cdiv(b, 2), 256))
    # MXU-friendly rounding of the M dimension.
    if tile >= 256:
        tile = (tile // 256) * 256
    elif tile >= 128:
        tile = (tile // 128) * 128
    else:
        tile = (tile // 8) * 8
    return max(8, min(tile, _round_up(b, 8)))


# ---------------------------------------------------------------------------
# Forward (project_assignment=False branch)
# ---------------------------------------------------------------------------
def cluster_assignment_forward(batch: jax.Array,
                               cluster_centers: jax.Array,
                               alpha: float = 1.0):
    """Forward pass of ClusterAssignment with project_assignment=False.

    batch:            [B, D] float
    cluster_centers:  [K, D] float
    returns: (soft_assignment [B, K], lossd=0.0, lossp=0.0)
    """
    B, D = batch.shape
    K, D2 = cluster_centers.shape
    assert D == D2

    # Lane-dense K: pad clusters to a multiple of 128 so the matmul output,
    # epilogue and stores are full-vreg / unmasked.
    K_pad = _round_up(K, 128)
    c32 = cluster_centers.astype(jnp.float32)
    if K_pad != K:
        c32 = jnp.zeros((K_pad, D), jnp.float32).at[:K].set(c32)

    # Hoisted ||c||^2 (computed once here, resident [1, K_pad] kernel input).
    # Padded entries get a large *finite* constant so their numerators
    # underflow to ~0 inside the kernel (mask folded into the data).
    c2 = jnp.sum(c32 * c32, axis=-1)
    if K_pad != K:
        c2 = c2.at[K:].set(jnp.float32(1e30))
    c2 = c2.reshape(1, K_pad)

    c_bf16 = c32.astype(jnp.bfloat16)   # resident MXU operand (half the footprint)
    x = batch.astype(jnp.float32)       # no padded copy of the batch

    budget = _vmem_budget_bytes()
    TILE_B = _choose_tile_b(B, D, K_pad, budget)
    num_tiles = _cdiv(B, TILE_B)        # ragged last tile masked by Pallas

    kernel = functools.partial(_cluster_assign_kernel,
                               inv_alpha=float(1.0 / alpha),
                               power=float(alpha + 1.0) / 2.0)

    vmem_limit = int(min(budget + (16 << 20), 100 << 20))

    soft_assign_pad = pl.pallas_call(
        kernel,
        out_shape=jax.ShapeDtypeStruct((B, K_pad), jnp.float32),
        grid=(num_tiles,),
        in_specs=[
            pl.BlockSpec((TILE_B, D), lambda i: (i, 0)),   # x row-tile (pipelined)
            pl.BlockSpec((K_pad, D), lambda i: (0, 0)),    # centers (constant)
            pl.BlockSpec((1, K_pad), lambda i: (0, 0)),    # ||c||^2 (constant)
        ],
        out_specs=pl.BlockSpec((TILE_B, K_pad), lambda i: (i, 0)),
        compiler_params=pltpu.CompilerParams(
            dimension_semantics=("parallel",),             # rows independent -> megacore
            vmem_limit_bytes=vmem_limit),
    )(x, c_bf16, c2)

    # TODO(synk): if the consumer tolerates lane-padded K, return the padded
    # slab directly and fuse this slice downstream to save an extra HBM pass.
    soft_assign = soft_assign_pad[:, :K] if K_pad != K else soft_assign_pad

    # project_assignment=False -> both auxiliary losses are constants 0.0
    lossp = jnp.asarray(0.0, jnp.float32)
    lossd = jnp.asarray(0.0, jnp.float32)
    # PyTorch returns (assignment, lossd, lossp) in this branch.
    return soft_assign, lossd, lossp


# ---------------------------------------------------------------------------
# Deterministic parameter init (mirrors __init__: xavier_uniform + Gram-Schmidt)
# ---------------------------------------------------------------------------
def _xavier_uniform(key, shape):
    fan_out, fan_in = shape  # torch 2-D convention
    bound = (6.0 / (fan_in + fan_out)) ** 0.5
    return jax.random.uniform(key, shape, jnp.float32, -bound, bound)


def _project(u, v):
    return jnp.dot(u, v) / jnp.dot(u, u) * u


def init_cluster_centers(key, cluster_number, embedding_dimension, orthogonal=True):
    init = _xavier_uniform(key, (cluster_number, embedding_dimension))
    if not orthogonal:
        return init
    work = [init[i] for i in range(cluster_number)]
    ortho = [work[0]]
    for i in range(1, cluster_number):
        proj = 0.0
        for j in range(i):
            proj = proj + _project(work[j], work[i])
        work[i] = work[i] - proj
        ortho.append(work[i] / jnp.linalg.norm(work[i]))
    return jnp.stack(ortho, axis=0)


# ---------------------------------------------------------------------------
# Demo
# ---------------------------------------------------------------------------
if __name__ == "__main__":
    cluster_number = 4
    embedding_dimension = 32
    batch_size = 8
    alpha = 1.0

    key = jax.random.PRNGKey(0)
    k_centers, k_batch = jax.random.split(key)

    cluster_centers = init_cluster_centers(
        k_centers, cluster_number, embedding_dimension, orthogonal=True)
    batch = jax.random.normal(k_batch, (batch_size, embedding_dimension),
                              jnp.float32)

    soft_assign, lossd, lossp = cluster_assignment_forward(
        batch, cluster_centers, alpha=alpha)
    jax.block_until_ready(soft_assign)

    # Sanity check against a pure-JAX reference of the same branch.
    # Tolerances account for the bf16 MXU operands and the EUP approximate
    # reciprocal used for the numerator inside the kernel.
    norm_sq = jnp.sum((batch[:, None, :] - cluster_centers[None, :, :]) ** 2, axis=2)
    num = (1.0 / (1.0 + norm_sq / alpha)) ** (float(alpha + 1.0) / 2.0)
    ref = num / jnp.sum(num, axis=1, keepdims=True)

    assert soft_assign.shape == (batch_size, cluster_number)
    assert jnp.allclose(soft_assign, ref, atol=2e-3, rtol=2e-3)
    assert float(lossd) == 0.0 and float(lossp) == 0.0

    print("KERNEL_OK")
</pallas_src>

<mosaic_0001>
module attributes {stable_mosaic.version = 11 : i64} {
  func.func @_cluster_assign_kernel(%arg0: i32, %arg1: memref<8x32xf32, #tpu.memory_space<vmem>>, %arg2: memref<128x32xbf16, #tpu.memory_space<vmem>>, %arg3: memref<1x128xf32, #tpu.memory_space<vmem>>, %arg4: memref<8x128xf32, #tpu.memory_space<vmem>>) attributes {dimension_semantics = [#tpu.dimension_semantics<parallel>], iteration_bounds = array<i64: 1>, scalar_prefetch = 0 : i64, scratch_operands = 0 : i64, tpu.core_type = #tpu.core_type<tc>, window_params = [{transform_indices = @transform_0, window_bounds = array<i64: 8, 32>}, {pipeline_mode = #tpu.pipeline_mode<synchronous>, transform_indices = @transform_1, window_bounds = array<i64: 128, 32>}, {pipeline_mode = #tpu.pipeline_mode<synchronous>, transform_indices = @transform_2, window_bounds = array<i64: 1, 128>}, {transform_indices = @transform_3, window_bounds = array<i64: 8, 128>}]} {
    %c0 = arith.constant 0 : index
    %c0_0 = arith.constant 0 : index
    %0 = vector.load %arg1[%c0, %c0_0] : memref<8x32xf32, #tpu.memory_space<vmem>>, vector<8x32xf32>
    %c0_1 = arith.constant 0 : index
    %c0_2 = arith.constant 0 : index
    %1 = vector.load %arg2[%c0_1, %c0_2] : memref<128x32xbf16, #tpu.memory_space<vmem>>, vector<128x32xbf16>
    %c0_3 = arith.constant 0 : index
    %c0_4 = arith.constant 0 : index
    %2 = vector.load %arg3[%c0_3, %c0_4] : memref<1x128xf32, #tpu.memory_space<vmem>>, vector<1x128xf32>
    %3 = arith.truncf %0 : vector<8x32xf32> to vector<8x32xbf16>
    %cst = arith.constant dense<0.000000e+00> : vector<8x128xf32>
    %4 = tpu.matmul %3, %1, %cst {dimension_numbers = #tpu.dot_dimension_numbers<[1], [1], [0], [0], [0, 0, 1, 0], [], []>} : vector<8x32xbf16>, vector<128x32xbf16>, vector<8x128xf32> -> vector<8x128xf32>
    %5 = arith.mulf %0, %0 : vector<8x32xf32>
    %cst_5 = arith.constant dense<0.000000e+00> : vector<8xf32>
    %6 = vector.multi_reduction <add>, %5, %cst_5 [1] : vector<8x32xf32> to vector<8xf32>
    %7 = vector.shape_cast %6 : vector<8xf32> to vector<8x1xf32>
    %8 = vector.broadcast %7 : vector<8x1xf32> to vector<8x128xf32>
    %9 = vector.broadcast %2 : vector<1x128xf32> to vector<8x128xf32>
    %10 = arith.addf %8, %9 : vector<8x128xf32>
    %cst_6 = arith.constant 2.000000e+00 : f32
    %11 = vector.broadcast %cst_6 : f32 to vector<8x128xf32>
    %12 = arith.mulf %11, %4 : vector<8x128xf32>
    %13 = arith.subf %10, %12 : vector<8x128xf32>
    %cst_7 = arith.constant 0.000000e+00 : f32
    %14 = vector.broadcast %cst_7 : f32 to vector<8x128xf32>
    %15 = arith.maximumf %13, %14 : vector<8x128xf32>
    %cst_8 = arith.constant 1.000000e+00 : f32
    %16 = vector.broadcast %cst_8 : f32 to vector<8x128xf32>
    %17 = arith.mulf %15, %16 : vector<8x128xf32>
    %cst_9 = arith.constant 1.000000e+00 : f32
    %18 = vector.broadcast %cst_9 : f32 to vector<8x128xf32>
    %19 = arith.addf %18, %17 : vector<8x128xf32>
    %20 = tpu.reciprocal %19 {approx = true} : vector<8x128xf32> -> vector<8x128xf32>
    %cst_10 = arith.constant dense<0.000000e+00> : vector<8xf32>
    %21 = vector.multi_reduction <add>, %20, %cst_10 [1] : vector<8x128xf32> to vector<8xf32>
    %22 = vector.shape_cast %21 : vector<8xf32> to vector<8x1xf32>
    %23 = vector.broadcast %22 : vector<8x1xf32> to vector<8x128xf32>
    %24 = arith.divf %20, %23 : vector<8x128xf32>
    %c0_11 = arith.constant 0 : index
    %c0_12 = arith.constant 0 : index
    %25 = vector.load %arg4[%c0_11, %c0_12] : memref<8x128xf32, #tpu.memory_space<vmem>>, vector<8x128xf32>
    tpu.vector_store %arg4[%c0_11, %c0_12], %24 {strides = array<i32>} : memref<8x128xf32, #tpu.memory_space<vmem>>, vector<8x128xf32>,
    return
  }
  func.func @transform_0(%arg0: i32) -> (i32, i32) {
    %c0_i32 = arith.constant 0 : i32
    %c0_i32_0 = arith.constant 0 : i32
    return %arg0, %c0_i32 : i32, i32
  }
  func.func @transform_1(%arg0: i32) -> (i32, i32) {
    %c0_i32 = arith.constant 0 : i32
    %c0_i32_0 = arith.constant 0 : i32
    %c0_i32_1 = arith.constant 0 : i32
    return %c0_i32, %c0_i32_0 : i32, i32
  }
  func.func @transform_2(%arg0: i32) -> (i32, i32) {
    %c0_i32 = arith.constant 0 : i32
    %c0_i32_0 = arith.constant 0 : i32
    %c0_i32_1 = arith.constant 0 : i32
    return %c0_i32, %c0_i32_0 : i32, i32
  }
  func.func @transform_3(%arg0: i32) -> (i32, i32) {
    %c0_i32 = arith.constant 0 : i32
    %c0_i32_0 = arith.constant 0 : i32
    return %arg0, %c0_i32 : i32, i32
  }
}

</mosaic_0001>

<bundles_post_ra>
// kernel: tpu_custom_call.1
= control target key start
LH: loop header
LB: loop body
LE: loop exit
PB: predicated region body
PF: predicated region fallthrough
CT: control target
= control target key end

     0   :  { %v254_v1 = vmov 0.0   ;;  %vm75_vm0 = vcmask 261120   ;;  %vm255_vm1 = vmmov 0   ;;  %s320_s0 = inlined_call_operand.vmem [shape: f32[8,32], index: 0, kind: input, shape index: {}]   ;;  %s321_s1 = inlined_call_operand.vmem [shape: bf16[128,32], index: 1, kind: input, shape index: {}]   ;;  %s322_s2 = inlined_call_operand.vmem [shape: f32[1,128], index: 2, kind: input, shape index: {}]   ;;  %s323_s3 = inlined_call_operand.hbm [shape: f32[8,128], index: 3, kind: output, shape index: {}]  }
   0x1   :  { %v220_v0 = vld [vmem:[%s321_s1 + $0x38] sm:$0xff]   ;;  %197 = vmatprep.subr.bf16.mxu0 %v254_v1  ;;  %v221_v3 = vld [vmem:[%s321_s1 + $0x30] sm:$0xff]   ;;  %v16_v5 = vld [vmem:[%s320_s0] sm:$0xff]  ;;  %213 = vmatprep.mubr.msk.bf16.mxu0 %vm255_vm1, %v254_v1 }
   0x2   :  { %v101_v2 = vsel %vm75_vm0, %v220_v0, 0  ;;  %v98_v4 = vsel %vm75_vm0, %v221_v3, 0  ;;  %v143_v6 = vmul.f32 %v16_v5, %v16_v5 }
   0x3   :  { %198 = vmatpush3.bf16.xpose.msra.mxu0 %v101_v2 }
   0x4   :  { %199 = vmatprep.subr.bf16.mxu0 %v254_v1 }
   0x5   :  { %8 = vsyncpa [#allocation3], 0  ;;  %v144_v7 = vsel %vm75_vm0, %v143_v6, 0.0  ;;  %v222_v8 = vld [vmem:[%s321_s1 + $0x28] sm:$0xff]   ;;  %v223_v10 = vld [vmem:[%s321_s1 + $0x20] sm:$0xff]   ;;  %v34_v20 = vpack.c.bf16 %v16_v5, %v16_v5 }
   0x6   :  { %145 = vadd.xlane.f32.xlu0 %v144_v7  ;;  %v95_v9 = vsel %vm75_vm0, %v222_v8, 0  ;;  %v92_v11 = vsel %vm75_vm0, %v223_v10, 0  ;;  %v224_v12 = vld [vmem:[%s321_s1 + $0x18] sm:$0xff]   ;;  %v225_v14 = vld [vmem:[%s321_s1 + $0x10] sm:$0xff]   ;;  %v226_v16 = vld [vmem:[%s321_s1 + $0x8] sm:$0xff]  }
   0x7   :  { %v89_v13 = vsel %vm75_vm0, %v224_v12, 0  ;;  %v86_v15 = vsel %vm75_vm0, %v225_v14, 0  ;;  %v83_v17 = vsel %vm75_vm0, %v226_v16, 0  ;;  %v227_v18 = vld [vmem:[%s321_s1] sm:$0xff]   ;;  %s256_s1 = smov [#allocation2]  }
   0x8   :  { %v80_v19 = vsel %vm75_vm0, %v227_v18, 0  ;;  %v187_v21 = vld [vmem:[%s322_s2] ss:$0 sm:$0xff]  ;;  %s170_s4 = sshll.u32 %s256_s1, 4  ;;  %s171_s4 = int_to_ptr.vmem [resolvable:$true] %s170_s4 }
   0x9   :  { %s232_s2 = scalar_lea.vmem %s171_s4, 128  ;;  %p237_p1 = scmp.lt.s32.totalorder %s171_s4, %s171_s4 }
   0xa   :  { %p233_p0 = scmp.ne.s32.totalorder %s171_s4, %s232_s2  ;;  %p238_p2 = scmp.lt.s32.totalorder %s232_s2, %s232_s2 }
   0xb   :  { %200 = vmatpush3.bf16.xpose.msra.mxu0 %v98_v4 }
   0xc   :  { %201 = vmatprep.subr.bf16.mxu0 %v254_v1  ;;  %p239_p3 = por %p238_p2, %p237_p1 }
   0xe   :  { %p240_p4 = pnand %p239_p3, %p233_p0 }
  0x13   :  { %202 = vmatpush3.bf16.xpose.msra.mxu0 %v95_v9 }
  0x14   :  { %203 = vmatprep.subr.bf16.mxu0 %v254_v1 }
  0x1b   :  { %204 = vmatpush3.bf16.xpose.msra.mxu0 %v92_v11 }
  0x1c   :  { %205 = vmatprep.subr.bf16.mxu0 %v254_v1 }
  0x23   :  { %206 = vmatpush3.bf16.xpose.msra.mxu0 %v89_v13 }
  0x24   :  { %207 = vmatprep.subr.bf16.mxu0 %v254_v1 }
  0x2b   :  { %208 = vmatpush3.bf16.xpose.msra.mxu0 %v86_v15 }
  0x2c   :  { %209 = vmatprep.subr.bf16.mxu0 %v254_v1 }
  0x33   :  { %210 = vmatpush3.bf16.xpose.msra.mxu0 %v83_v17 }
  0x34   :  { %211 = vmatprep.subr.bf16.mxu0 %v254_v1 }
  0x3b   :  { %212 = vmatpush3.bf16.xpose.msra.mxu0 %v80_v19 }
  0x42   :  { %214 = vmatmul.mubr.msk.bf16.vlgmr.msra.gmra.mxu0 %vm75_vm0, %v34_v20 }
  0x8f   :  { %v146_v22 = vpop.xlane.xlu0 %145 }
  0x90   :  { %v153_v23 = vadd.f32 %v187_v21, %v146_v22 }
 0x102   :  { %v137_v24 = vpop.f32.mrf.mxu0 }
 0x103   :  { %v154_v25 = vmul.f32 2.0, %v137_v24 }
 0x104   :  { %v215_v26 = vpop.f32.mrf.mxu0 }
 0x105   :  { %v155_v27 = vsub.f32 %v153_v23, %v154_v25 }
 0x106   :  { %v140_v28 = vpop.f32.mrf.mxu0 }
 0x107   :  { %v156_v29 = vmax.f32 %v155_v27, 0.0 }
 0x108   :  { %v216_v30 = vpop.f32.mrf.mxu0 }
 0x109   :  { %v157_v31 = vadd.f32 1.0, %v156_v29 }
 0x10b   :  { %228 = vrcp.f32 %v157_v31 }
 0x118   :  { %v229_v32 = vpop.eup %228 }
 0x119   :  { %159 = vadd.xlane.f32.xlu0 %v229_v32 }
 0x1a2   :  { %v160_v33 = vpop.xlane.xlu0 %159 }
 0x1a3   :  { %230 = vrcp.f32 %v160_v33 }
 0x1b0   :  { %v231_v34 = vpop.eup %230 }
 0x1b1   :  { %v162_v35 = vmul.f32 %v231_v34, %v229_v32 }
 0x1b3   :  { %163 = vst [vmem:[#allocation2] sm:$0xff] %v162_v35 }
 0x1b4   :  { %243 = shalt.err (!%p240_p4)
}
 0x1b5   :  { %173 = dma.vmem_to_hbm [thread:$0]  %s171_s4, 128, %s323_s3, [#allocation3]  }
 0x1b6   :  { %252 = dma.done.wait [#allocation3], 128  }
 0x1b7   :  { %253 = vsyncadd [#allocation3], 4294967168 }
 0x1b8   :  { %177 = vsyncpa [#allocation3], 1 }

</bundles_post_ra>
